<compile_context>
chip_gen: v6e
topology: v6e:2x2x1
jax: 0.10.0
libtpu: 0.0.40
codegen_flags: <defaults>
</compile_context>

<pallas_src>
import functools

import jax
import jax.numpy as jnp
from jax import lax
from jax.experimental import pallas as pl
from jax.experimental.pallas import tpu as pltpu


def _round_up(n, m):
    return ((n + m - 1) // m) * m


def _vmem_capacity_bytes():
    """Physical VMEM of the local chip (conservative fallback if unknown)."""
    try:
        info = pltpu.get_tpu_info()
        return int(getattr(info, "vmem_capacity_bytes", 64 << 20))
    except Exception:
        return 64 << 20


def _resident_block_spec(block_shape, index_map):
    """BlockSpec for a grid-invariant operand: request single buffering."""
    try:
        return pl.BlockSpec(block_shape, index_map,
                            pipeline_mode=pl.Buffered(buffer_count=1))
    except TypeError:  # older BlockSpec without pipeline_mode
        return pl.BlockSpec(block_shape, index_map)


# ---------------------------------------------------------------------------
# Fully fused kernel for small graphs (everything resident in VMEM).
# ---------------------------------------------------------------------------
def _fused_kernel(scalars_ref, cs_ref, x_ref, w_ref, out_ref, *, c_real):
    # scalars (SMEM f32[3]): [alpha_agbn, beta_agbn, sample]
    alpha = scalars_ref[0]
    beta = scalars_ref[1]
    sample = scalars_ref[2]

    cs = cs_ref[...]                                     # [cp, cp] f32
    cp = cs.shape[0]
    row = lax.broadcasted_iota(jnp.int32, (cp, cp), 0)
    col = lax.broadcasted_iota(jnp.int32, (cp, cp), 1)
    valid = (row < c_real) & (col < c_real)              # mask padded border

    lam = jnp.maximum(alpha * cs + beta, 0.0)
    thrp = 1.0 - jnp.exp(-lam)
    a = jnp.where((sample < thrp) & valid, 1.0, 0.0)

    col_sum = jnp.sum(a, axis=0, keepdims=True)          # sum over rows (dim 0)
    a = a * (0.5 / (col_sum + 1e-6))
    a = jnp.where(row == col, a + 1.0, a)                # A += I (padded diag -> 1)

    dinv = lax.rsqrt(jnp.sum(a, axis=1, keepdims=True))  # [cp, 1]
    ahat = (a * dinv).astype(jnp.bfloat16)               # A_hat[i,j] = dinv[i]*A[i,j]

    support = jnp.dot(x_ref[...], w_ref[...],
                      preferred_element_type=jnp.float32)     # [cp, F_out_p]
    # out[j,:] = dinv[j] * sum_i A_hat[i,j] * support[i,:]
    # (single small tile: the dim-0 contraction here has no per-step cost).
    prop = lax.dot_general(ahat, support.astype(jnp.bfloat16),
                           (((0,), (0,)), ((), ())),
                           preferred_element_type=jnp.float32)
    out_ref[...] = (dinv * prop).astype(out_ref.dtype)


# ---------------------------------------------------------------------------
# Pass 1 (gridded path): adjacency prep in the transposed frame.
# Input is cs^T; outputs A_hat^T (bf16) and dinv as a [1, cp] row — no
# in-kernel matrix transpose is needed.
# ---------------------------------------------------------------------------
def _adj_kernel(scalars_ref, csT_ref, ahatT_ref, dinv_row_ref, *, c_real):
    alpha = scalars_ref[0]
    beta = scalars_ref[1]
    sample = scalars_ref[2]

    cst = csT_ref[...]                                   # cst[j, i] = cs[i, j]
    cp = cst.shape[0]
    row = lax.broadcasted_iota(jnp.int32, (cp, cp), 0)   # j
    col = lax.broadcasted_iota(jnp.int32, (cp, cp), 1)   # i
    valid = (row < c_real) & (col < c_real)

    lam = jnp.maximum(alpha * cst + beta, 0.0)
    thrp = 1.0 - jnp.exp(-lam)
    at = jnp.where((sample < thrp) & valid, 1.0, 0.0)    # at[j, i] = A0[i, j]

    # Column normalisation of A == row normalisation of A^T.
    norm = jnp.sum(at, axis=1, keepdims=True)            # [cp, 1] indexed by j
    at = at * (0.5 / (norm + 1e-6))
    at = jnp.where(row == col, at + 1.0, at)             # (A + I)^T; padded diag -> 1

    # d[i] = A.sum(1)[i]^-1/2  == column sums of A^T.
    dinv_row = lax.rsqrt(jnp.sum(at, axis=0, keepdims=True))   # [1, cp] indexed by i
    dinv_row_ref[...] = dinv_row
    # A_hat^T[j, i] = dinv[i] * A[i, j]
    ahatT_ref[...] = (at * dinv_row).astype(ahatT_ref.dtype)


# ---------------------------------------------------------------------------
# Projection pass (project_after=False): XW = x @ W, each row block once.
# ---------------------------------------------------------------------------
def _proj_kernel(x_ref, w_ref, xw_ref):
    xw_ref[...] = jnp.dot(x_ref[...], w_ref[...],
                          preferred_element_type=jnp.float32).astype(xw_ref.dtype)


# ---------------------------------------------------------------------------
# Pass 2a: out[j,:] = dinv[j] * sum_i A_hat^T[j,i] @ XW[i,:]
# Accumulates directly into the resident output block (no scratch).
# ---------------------------------------------------------------------------
def _gcn_noproj_kernel(dinv_ref, ahatT_ref, xw_ref, out_ref):
    i = pl.program_id(1)

    @pl.when(i == 0)
    def _():
        out_ref[...] = jnp.zeros_like(out_ref)

    out_ref[...] += jnp.dot(ahatT_ref[...], xw_ref[...],
                            preferred_element_type=jnp.float32)

    @pl.when(i == pl.num_programs(1) - 1)
    def _():
        out_ref[...] *= dinv_ref[...]


# ---------------------------------------------------------------------------
# Pass 2b (F_in <= F_out): contract against x (narrow), project once at the end.
# ---------------------------------------------------------------------------
def _gcn_proj_kernel(dinv_ref, ahatT_ref, x_ref, w_ref, out_ref, acc_ref):
    i = pl.program_id(1)

    @pl.when(i == 0)
    def _():
        acc_ref[...] = jnp.zeros_like(acc_ref)

    acc_ref[...] += jnp.dot(ahatT_ref[...], x_ref[...],
                            preferred_element_type=jnp.float32)

    @pl.when(i == pl.num_programs(1) - 1)
    def _():
        h = (dinv_ref[...] * acc_ref[...]).astype(jnp.bfloat16)
        out_ref[...] = jnp.dot(h, w_ref[...],
                               preferred_element_type=jnp.float32
                               ).astype(out_ref.dtype)


# ---------------------------------------------------------------------------
# Wrapper
# ---------------------------------------------------------------------------
@functools.partial(jax.jit, static_argnames=("phase", "tc_override"))
def adapgbn_forward(x, cs, normalize_weight, alpha_agbn, beta_agbn,
                    threshold, sample_train, phase="val", tc_override=None):
    """x: [C, F_in] f32, cs: [C, C] f32, normalize_weight: [F_in, F_out] f32."""
    C, f_in = x.shape
    f_out = normalize_weight.shape[1]

    sample = threshold if phase == "val" else sample_train
    scalars = jnp.stack([
        jnp.asarray(alpha_agbn, jnp.float32).reshape(()),
        jnp.asarray(beta_agbn, jnp.float32).reshape(()),
        jnp.asarray(sample, jnp.float32).reshape(()),
    ])

    f_in_p = _round_up(f_in, 128)
    f_out_p = _round_up(f_out, 128)

    # Generation-aware budgets (trace-time query; conservative fallback).
    cap = _vmem_capacity_bytes()
    small_vmem = cap < (96 << 20)                 # v7x-like (64 MiB/TC) or unknown
    vmem_limit = max(32 << 20, min(int(cap) * 3 // 4, 110 << 20))
    tc_cap = 256 if small_vmem else 512           # bigger row tiles on 128-MiB parts

    cp_min = _round_up(C, 8)
    fused = (tc_override is None and cp_min <= 256
             and f_in_p <= 1024 and f_out_p <= 1024)

    if fused:
        cp = cp_min
        tc = cp
    else:
        if tc_override is not None:
            assert tc_override % 128 == 0, "tc_override must be a multiple of 128"
            tc = tc_override
        else:
            tc = min(tc_cap, cp_min)
            # v7x megacore: prefer >= 2 blocks on the "parallel" row axis.
            if small_vmem and C > 128 and _round_up(C, tc) == tc:
                tc = 128
        cp = _round_up(C, tc)

    # TODO(synk): cache the padded/bf16-cast weight (and cs cast) across calls
    # when this layer is applied repeatedly; they are re-padded every forward here.
    x_p = jnp.pad(x.astype(jnp.float32),
                  ((0, cp - C), (0, f_in_p - f_in))).astype(jnp.bfloat16)
    w_p = jnp.pad(normalize_weight.astype(jnp.float32),
                  ((0, f_in_p - f_in), (0, f_out_p - f_out))).astype(jnp.bfloat16)

    if fused:
        cs_p = jnp.pad(cs.astype(jnp.float32), ((0, cp - C), (0, cp - C)))
        out_p = pl.pallas_call(
            functools.partial(_fused_kernel, c_real=C),
            out_shape=jax.ShapeDtypeStruct((cp, f_out_p), jnp.float32),
            in_specs=[
                pl.BlockSpec(memory_space=pltpu.MemorySpace.SMEM),   # scalars
                pl.BlockSpec(memory_space=pltpu.MemorySpace.VMEM),   # cs
                pl.BlockSpec(memory_space=pltpu.MemorySpace.VMEM),   # x
                pl.BlockSpec(memory_space=pltpu.MemorySpace.VMEM),   # W
            ],
            out_specs=pl.BlockSpec(memory_space=pltpu.MemorySpace.VMEM),
            compiler_params=pltpu.CompilerParams(vmem_limit_bytes=vmem_limit),
        )(scalars, cs_p, x_p, w_p)
        return out_p[:C, :f_out]

    # ---- pass 1: adjacency prep (A_hat^T, dinv), fed with cs^T ----
    csT_p = jnp.pad(cs.astype(jnp.float32).T, ((0, cp - C), (0, cp - C)))
    ahatT, dinv_row = pl.pallas_call(
        functools.partial(_adj_kernel, c_real=C),
        out_shape=(jax.ShapeDtypeStruct((cp, cp), jnp.bfloat16),
                   jax.ShapeDtypeStruct((1, cp), jnp.float32)),
        in_specs=[
            pl.BlockSpec(memory_space=pltpu.MemorySpace.SMEM),       # scalars
            pl.BlockSpec(memory_space=pltpu.MemorySpace.VMEM),       # cs^T
        ],
        out_specs=(pl.BlockSpec(memory_space=pltpu.MemorySpace.VMEM),
                   pl.BlockSpec(memory_space=pltpu.MemorySpace.VMEM)),
        compiler_params=pltpu.CompilerParams(vmem_limit_bytes=vmem_limit),
    )(scalars, csT_p)
    dinv = dinv_row.reshape(cp, 1)
    # TODO(synk): tile pass 1 over row blocks (two-step column-sum reduction) for
    # very large C; the un-gridded block caps cp at a few thousand nodes.

    project_after = f_in <= f_out          # association order by min(F_in, F_out)
    grid = (cp // tc, cp // tc)            # (output-row blocks, contraction blocks)

    if not project_after:
        # Hoist x @ W: each row block is projected exactly once.
        xw = pl.pallas_call(
            _proj_kernel,
            out_shape=jax.ShapeDtypeStruct((cp, f_out_p), jnp.bfloat16),
            grid_spec=pltpu.PrefetchScalarGridSpec(
                num_scalar_prefetch=0,
                grid=(cp // tc,),
                in_specs=[
                    pl.BlockSpec((tc, f_in_p), lambda r: (r, 0)),
                    _resident_block_spec((f_in_p, f_out_p), lambda r: (0, 0)),
                ],
                out_specs=pl.BlockSpec((tc, f_out_p), lambda r: (r, 0)),
            ),
            compiler_params=pltpu.CompilerParams(
                dimension_semantics=("parallel",),
                vmem_limit_bytes=vmem_limit),
        )(x_p, w_p)

        out_p = pl.pallas_call(
            _gcn_noproj_kernel,
            out_shape=jax.ShapeDtypeStruct((cp, f_out_p), jnp.float32),
            grid_spec=pltpu.PrefetchScalarGridSpec(
                num_scalar_prefetch=0,
                grid=grid,
                in_specs=[
                    pl.BlockSpec((tc, 1), lambda j, i: (j, 0)),        # dinv rows j
                    pl.BlockSpec((tc, tc), lambda j, i: (j, i)),       # A_hat^T[j,i]
                    pl.BlockSpec((tc, f_out_p), lambda j, i: (i, 0)),  # XW rows i
                ],
                out_specs=pl.BlockSpec((tc, f_out_p), lambda j, i: (j, 0)),
            ),
            compiler_params=pltpu.CompilerParams(
                dimension_semantics=("parallel", "arbitrary"),
                vmem_limit_bytes=vmem_limit),
        )(dinv, ahatT, xw)
    else:
        out_p = pl.pallas_call(
            _gcn_proj_kernel,
            out_shape=jax.ShapeDtypeStruct((cp, f_out_p), jnp.float32),
            grid_spec=pltpu.PrefetchScalarGridSpec(
                num_scalar_prefetch=0,
                grid=grid,
                in_specs=[
                    pl.BlockSpec((tc, 1), lambda j, i: (j, 0)),        # dinv rows j
                    pl.BlockSpec((tc, tc), lambda j, i: (j, i)),       # A_hat^T[j,i]
                    pl.BlockSpec((tc, f_in_p), lambda j, i: (i, 0)),   # x rows i
                    _resident_block_spec((f_in_p, f_out_p),
                                         lambda j, i: (0, 0)),         # W resident
                ],
                out_specs=pl.BlockSpec((tc, f_out_p), lambda j, i: (j, 0)),
                scratch_shapes=[pltpu.VMEM((tc, f_in_p), jnp.float32)],
            ),
            compiler_params=pltpu.CompilerParams(
                dimension_semantics=("parallel", "arbitrary"),
                vmem_limit_bytes=vmem_limit),
        )(dinv, ahatT, x_p, w_p)

    # TODO(synk): bias=True variant (Parameter of shape (1,1,out_features)) omitted;
    # the module's default constructor uses bias=False.
    return out_p[:C, :f_out]


# ---------------------------------------------------------------------------
# Pure-JAX reference of the module forward (tolerance check).
# ---------------------------------------------------------------------------
def adapgbn_reference(x, cs, w, alpha, beta, threshold, sample_train, phase="val"):
    sample = threshold if phase == "val" else sample_train
    lam = jnp.maximum(alpha * cs + beta, 0.0)
    thrp = 1.0 - jnp.exp(-lam)
    A = jnp.where(sample < thrp, 1.0, 0.0)
    A = A * 0.5 / (jnp.sum(A, axis=0, keepdims=True) + 1e-6)
    A = A + jnp.eye(cs.shape[0], dtype=jnp.float32)
    d = jnp.sum(A, axis=1) ** -0.5
    adj = (A @ jnp.diag(d)).T @ jnp.diag(d)
    return adj @ (x @ w)


if __name__ == "__main__":
    key = jax.random.PRNGKey(0)

    def make_case(k, C, f_in, f_out):
        k_w, k_x, k_cs, k_s = jax.random.split(k, 4)
        stdv = 1.0 / (f_out ** 0.5)                      # reset_parameters()
        w = jax.random.uniform(k_w, (f_in, f_out), jnp.float32,
                               minval=-stdv, maxval=stdv)
        x = jax.random.normal(k_x, (C, f_in), jnp.float32)
        # Quantize cs so the Bernoulli threshold comparison (sample < thrp)
        # cannot flip between kernel-exp and reference-exp rounding.
        cs = jnp.floor(jax.random.uniform(k_cs, (C, C), jnp.float32) * 5.0) / 5.0
        # 'train'-phase scalar: mean of S=1400 uniforms (host-side in the module).
        s_tr = jnp.mean(jax.random.uniform(k_s, (1400,), jnp.float32))
        return x, cs, w, s_tr

    alpha_agbn = jnp.float32(1.4)   # alpha_agbn.data.fill_(1.4)
    beta_agbn = jnp.float32(0.0)    # beta_agbn.data.fill_(0)
    threshold = jnp.float32(0.5)

    cases = [
        # (C, f_in, f_out, tc_override, phase)
        (8,   16, 32, None, "val"),    # small-C fully fused path
        (8,   16, 32, None, "train"),  # train-phase scalar sample
        (300, 64, 48, 128,  "val"),    # gridded, XW hoisted (f_out < f_in)
        (300, 48, 64, 128,  "val"),    # gridded, project-at-end (f_in <= f_out)
    ]
    keys = jax.random.split(key, len(cases))
    for (C, f_in, f_out, tc_ov, phase), k in zip(cases, keys):
        x, cs, w, s_tr = make_case(k, C, f_in, f_out)
        out = adapgbn_forward(x, cs, w, alpha_agbn, beta_agbn,
                              threshold, s_tr, phase=phase, tc_override=tc_ov)
        out = jax.block_until_ready(out)
        assert out.shape == (C, f_out) and out.dtype == jnp.float32
        ref = adapgbn_reference(x, cs, w, alpha_agbn, beta_agbn,
                                threshold, s_tr, phase=phase)
        max_err = float(jnp.max(jnp.abs(out - ref)))
        # bf16 MXU operands with f32 accumulation -> modest tolerance vs f32 ref.
        assert jnp.allclose(out, ref, rtol=5e-2, atol=5e-2), \
            (C, f_in, f_out, phase, max_err)
    print("KERNEL_OK")
</pallas_src>

<mosaic_0001>
module attributes {stable_mosaic.version = 11 : i64} {
  func.func @_fused_kernel(%arg0: memref<3xf32, #tpu.memory_space<smem>>, %arg1: memref<8x8xf32, #tpu.memory_space<vmem>>, %arg2: memref<8x128xbf16, #tpu.memory_space<vmem>>, %arg3: memref<128x128xbf16, #tpu.memory_space<vmem>>, %arg4: memref<8x128xf32, #tpu.memory_space<vmem>>) attributes {dimension_semantics = [], scalar_prefetch = 0 : i64, scratch_operands = 0 : i64, tpu.core_type = #tpu.core_type<tc>} {
    %c0 = arith.constant 0 : index
    %0 = memref.load %arg0[%c0] : memref<3xf32, #tpu.memory_space<smem>>
    %c1 = arith.constant 1 : index
    %1 = memref.load %arg0[%c1] : memref<3xf32, #tpu.memory_space<smem>>
    %c2 = arith.constant 2 : index
    %2 = memref.load %arg0[%c2] : memref<3xf32, #tpu.memory_space<smem>>
    %c0_0 = arith.constant 0 : index
    %c0_1 = arith.constant 0 : index
    %3 = vector.load %arg1[%c0_0, %c0_1] : memref<8x8xf32, #tpu.memory_space<vmem>>, vector<8x8xf32>
    %4 = tpu.iota {dimensions = array<i32: 0>} : vector<8x8xi32>
    %5 = tpu.iota {dimensions = array<i32: 1>} : vector<8x8xi32>
    %c8_i32 = arith.constant 8 : i32
    %6 = vector.broadcast %c8_i32 : i32 to vector<8x8xi32>
    %7 = arith.cmpi slt, %4, %6 : vector<8x8xi32>
    %c8_i32_2 = arith.constant 8 : i32
    %8 = vector.broadcast %c8_i32_2 : i32 to vector<8x8xi32>
    %9 = arith.cmpi slt, %5, %8 : vector<8x8xi32>
    %10 = arith.andi %7, %9 : vector<8x8xi1>
    %11 = vector.broadcast %0 : f32 to vector<8x8xf32>
    %12 = arith.mulf %11, %3 : vector<8x8xf32>
    %13 = vector.broadcast %1 : f32 to vector<8x8xf32>
    %14 = arith.addf %12, %13 : vector<8x8xf32>
    %cst = arith.constant 0.000000e+00 : f32
    %15 = vector.broadcast %cst : f32 to vector<8x8xf32>
    %16 = arith.maximumf %14, %15 : vector<8x8xf32>
    %cst_3 = arith.constant 0.000000e+00 : f32
    %17 = vector.broadcast %cst_3 : f32 to vector<8x8xf32>
    %18 = arith.subf %17, %16 : vector<8x8xf32>
    %19 = math.exp %18 : vector<8x8xf32>
    %cst_4 = arith.constant 1.000000e+00 : f32
    %20 = vector.broadcast %cst_4 : f32 to vector<8x8xf32>
    %21 = arith.subf %20, %19 : vector<8x8xf32>
    %22 = vector.broadcast %2 : f32 to vector<8x8xf32>
    %23 = arith.cmpf olt, %22, %21 : vector<8x8xf32>
    %24 = arith.andi %23, %10 : vector<8x8xi1>
    %cst_5 = arith.constant 1.000000e+00 : f32
    %cst_6 = arith.constant 0.000000e+00 : f32
    %25 = vector.broadcast %cst_5 : f32 to vector<8x8xf32>
    %26 = vector.broadcast %cst_6 : f32 to vector<8x8xf32>
    %27 = arith.select %24, %25, %26 : vector<8x8xi1>, vector<8x8xf32>
    %cst_7 = arith.constant dense<0.000000e+00> : vector<8xf32>
    %28 = vector.multi_reduction <add>, %27, %cst_7 [0] : vector<8x8xf32> to vector<8xf32>
    %29 = vector.shape_cast %28 : vector<8xf32> to vector<1x8xf32>
    %cst_8 = arith.constant 9.99999997E-7 : f32
    %30 = vector.broadcast %cst_8 : f32 to vector<1x8xf32>
    %31 = arith.addf %29, %30 : vector<1x8xf32>
    %cst_9 = arith.constant 5.000000e-01 : f32
    %32 = vector.broadcast %cst_9 : f32 to vector<1x8xf32>
    %33 = arith.divf %32, %31 : vector<1x8xf32>
    %34 = vector.broadcast %33 : vector<1x8xf32> to vector<8x8xf32>
    %35 = arith.mulf %27, %34 : vector<8x8xf32>
    %36 = arith.cmpi eq, %4, %5 : vector<8x8xi32>
    %cst_10 = arith.constant 1.000000e+00 : f32
    %37 = vector.broadcast %cst_10 : f32 to vector<8x8xf32>
    %38 = arith.addf %35, %37 : vector<8x8xf32>
    %39 = arith.select %36, %38, %35 : vector<8x8xi1>, vector<8x8xf32>
    %cst_11 = arith.constant dense<0.000000e+00> : vector<8xf32>
    %40 = vector.multi_reduction <add>, %39, %cst_11 [1] : vector<8x8xf32> to vector<8xf32>
    %41 = vector.shape_cast %40 : vector<8xf32> to vector<8x1xf32>
    %42 = math.rsqrt %41 : vector<8x1xf32>
    %43 = vector.broadcast %42 : vector<8x1xf32> to vector<8x8xf32>
    %44 = arith.mulf %39, %43 : vector<8x8xf32>
    %45 = arith.truncf %44 : vector<8x8xf32> to vector<8x8xbf16>
    %c0_12 = arith.constant 0 : index
    %c0_13 = arith.constant 0 : index
    %46 = vector.load %arg2[%c0_12, %c0_13] : memref<8x128xbf16, #tpu.memory_space<vmem>>, vector<8x128xbf16>
    %c0_14 = arith.constant 0 : index
    %c0_15 = arith.constant 0 : index
    %47 = vector.load %arg3[%c0_14, %c0_15] : memref<128x128xbf16, #tpu.memory_space<vmem>>, vector<128x128xbf16>
    %cst_16 = arith.constant dense<0.000000e+00> : vector<8x128xf32>
    %48 = tpu.matmul %46, %47, %cst_16 {dimension_numbers = #tpu.dot_dimension_numbers<[1], [0], [0], [1], [0, 0, 1, 1], [], []>} : vector<8x128xbf16>, vector<128x128xbf16>, vector<8x128xf32> -> vector<8x128xf32>
    %49 = arith.truncf %48 : vector<8x128xf32> to vector<8x128xbf16>
    %cst_17 = arith.constant dense<0.000000e+00> : vector<8x128xf32>
    %50 = tpu.matmul %45, %49, %cst_17 {dimension_numbers = #tpu.dot_dimension_numbers<[0], [0], [1], [1], [0, 1, 1, 1], [], []>} : vector<8x8xbf16>, vector<8x128xbf16>, vector<8x128xf32> -> vector<8x128xf32>
    %51 = vector.broadcast %42 : vector<8x1xf32> to vector<8x128xf32>
    %52 = arith.mulf %51, %50 : vector<8x128xf32>
    %c0_18 = arith.constant 0 : index
    %c0_19 = arith.constant 0 : index
    %53 = vector.load %arg4[%c0_18, %c0_19] : memref<8x128xf32, #tpu.memory_space<vmem>>, vector<8x128xf32>
    tpu.vector_store %arg4[%c0_18, %c0_19], %52 {strides = array<i32>} : memref<8x128xf32, #tpu.memory_space<vmem>>, vector<8x128xf32>,
    return
  }
}

</mosaic_0001>

<bundles_post_ra>
// kernel: adapgbn_forward.1
= control target key start
LH: loop header
LB: loop body
LE: loop exit
PB: predicated region body
PF: predicated region fallthrough
CT: control target
= control target key end

     0   :  { %9 = vsyncpa [#allocation4], 0  ;;  %s434_s0 = inlined_call_operand.vmem [shape: f32[3], index: 0, kind: input, shape index: {}]   ;;  %s435_s1 = inlined_call_operand.vmem [shape: f32[8,8], index: 1, kind: input, shape index: {}]   ;;  %s436_s2 = inlined_call_operand.vmem [shape: bf16[8,128], index: 2, kind: input, shape index: {}]   ;;  %s437_s3 = inlined_call_operand.vmem [shape: bf16[128,128], index: 3, kind: input, shape index: {}]   ;;  %s438_s4 = inlined_call_operand.hbm [shape: f32[8,128], index: 4, kind: output, shape index: {}]  }
   0x1   :  { %10 = vsyncpa [#allocation3], 0  ;;  %s17_s17 = sshll.u32 %s434_s0, 4  ;;  %s18_s17 = int_to_ptr.vmem [resolvable:$true] %s17_s17 }
   0x2   :  { %s330_s18 = scalar_lea.vmem %s18_s17, 16  ;;  %p335_p1 = scmp.lt.s32.totalorder %s18_s17, %s18_s17 }
   0x3   :  { %p331_p0 = scmp.ne.s32.totalorder %s18_s17, %s330_s18  ;;  %p336_p2 = scmp.lt.s32.totalorder %s330_s18, %s330_s18 }
   0x5   :  { %p337_p3 = por %p336_p2, %p335_p1 }
   0x7   :  { %p338_p4 = pnand %p337_p3, %p331_p0 }
   0x9   :  { %341 = shalt.err (!%p338_p4)
}
   0xa   :  { %s366_s19 = smov [#allocation2]  }
   0xb   :  { %20 = dma.vmem_to_smem %s18_s17, 16, %s366_s19, [#allocation4]  }
   0xc   :  { %362 = dma.done.wait [#allocation4], 16  }
   0xd   :  { %363 = vsyncadd [#allocation4], 4294967280 }
   0xe   :  { %30 = sfence }
   0xf   :  { %s32_s20 = sld [smem:[#allocation2]]  ;;  %v316_v0 = vld [vmem:[%s437_s3 + $0x38] sm:$0xff]   ;;  %v367_v1 = vmov 0.0   ;;  %v317_v2 = vld [vmem:[%s437_s3 + $0x30] sm:$0xff]   ;;  %v35_v3 = vld [vmem:[%s435_s1] sm:$0xff]  ;;  %vm368_vm0 = vmmov 0   ;;  %v36_v16 = vlaneseq }
  0x10   :  { %s263_s23 = sld [smem:[#allocation2 + $0x1]]  ;;  %285 = vmatprep.subr.bf16.mxu0 %v367_v1  ;;  %305 = vmatprep.subr.bf16.mxu1 %v367_v1  ;;  %v318_v5 = vld [vmem:[%s437_s3 + $0x28] sm:$0xff]   ;;  %v319_v9 = vld [vmem:[%s437_s3 + $0x20] sm:$0xff]   ;;  %v320_v12 = vld [vmem:[%s437_s3 + $0x18] sm:$0xff]   ;;  %vm56_vm3 = vcmask 64512   ;;  %vm202_vm6 = vcmask 1043456  }
  0x11   :  { %286 = vmatpush3.bf16.msra.mxu0 %v316_v0  ;;  %301 = vmatprep.mubr.msk.bf16.mxu0 %vm368_vm0, %v367_v1  ;;  %v321_v14 = vld [vmem:[%s437_s3 + $0x10] sm:$0xff]   ;;  %s264_s8 = sld [smem:[#allocation2 + $0x2]]  ;;  %v322_v15 = vld [vmem:[%s437_s3 + $0x8] sm:$0xff]   ;;  %v323_v17 = vld [vmem:[%s437_s3] sm:$0xff]   ;;  %v39_v18 = vand.u32 127, %v36_v16  ;;  %v37_v33 = vshrl.u32 %v36_v16, 7 }
  0x12   :  { %287 = vmatprep.subr.bf16.mxu0 %v367_v1  ;;  %307 = vmatprep.mubr.msk.bf16.mxu1 %vm368_vm0, %v367_v1  ;;  %v77_v21 = vld [vmem:[%s436_s2] sm:$0xf]  ;;  %s369_s2 = smov [#allocation5]  }
  0x13   :  { %vm41_vm1 = vcmp.lt.s32.totalorder %v39_v18, 8  ;;  %vm68_vm5 = vcmp.eq.s32.totalorder %v37_v33, %v39_v18  ;;  %s254_s3 = sshll.u32 %s369_s2, 4  ;;  %s255_s3 = int_to_ptr.vmem [resolvable:$true] %s254_s3 }
  0x14   :  { %s342_s15 = scalar_lea.vmem %s255_s3, 128  ;;  %p347_p6 = scmp.lt.s32.totalorder %s255_s3, %s255_s3 }
  0x15   :  { %v43_v4 = vstv %s32_s20  ;;  %288 = vmatpush3.bf16.msra.mxu0 %v317_v2  ;;  %p343_p5 = scmp.ne.s32.totalorder %s255_s3, %s342_s15  ;;  %p348_p7 = scmp.lt.s32.totalorder %s342_s15, %s342_s15 }
  0x16   :  { %v44_v6 = vmul.f32 %v43_v4, %v35_v3  ;;  %v45_v7 = vstv %s263_s23  ;;  %289 = vmatprep.subr.bf16.mxu0 %v367_v1 }
  0x17   :  { %v52_v20 = vstv %s264_s8  ;;  %p349_p8 = por %p348_p7, %p347_p6 }
  0x18   :  { %v46_v8 = vadd.f32 %v45_v7, %v44_v6 }
  0x19   :  { %290 = vmatpush3.bf16.msra.mxu0 %v318_v5  ;;  %p350_p9 = pnand %p349_p8, %p343_p5 }
  0x1a   :  { %v47_v10 = vmax.f32 %v46_v8, 0.0  ;;  %291 = vmatprep.subr.bf16.mxu0 %v367_v1 }
  0x1c   :  { %v48_v11 = vsub.f32 0.0, %v47_v10 }
  0x1d   :  { %292 = vmatpush3.bf16.msra.mxu0 %v319_v9 }
  0x1e   :  { %v49_v13 = vmul.f32 1.442695, %v48_v11  ;;  %293 = vmatprep.subr.bf16.mxu0 %v367_v1 }
  0x20   :  { %324 = vpow2.f32 %v49_v13 }
  0x21   :  { %294 = vmatpush3.bf16.msra.mxu0 %v320_v12 }
  0x22   :  { %295 = vmatprep.subr.bf16.mxu0 %v367_v1 }
  0x25   :  { %296 = vmatpush3.bf16.msra.mxu0 %v321_v14 }
  0x26   :  { %297 = vmatprep.subr.bf16.mxu0 %v367_v1 }
  0x29   :  { %298 = vmatpush3.bf16.msra.mxu0 %v322_v15 }
  0x2a   :  { %299 = vmatprep.subr.bf16.mxu0 %v367_v1 }
  0x2d   :  { %v325_v19 = vpop.eup %324  ;;  %300 = vmatpush3.bf16.msra.mxu0 %v323_v17 }
  0x2e   :  { %v51_v22 = vsub.f32 1.0, %v325_v19 }
  0x30   :  { %vm53_vm2 = vcmp.lt.f32.partialorder %v52_v20, %v51_v22  ;;  %302 = vmatmul.mubr.bf16.vlgmr.msra.gmra.mxu0 %v77_v21 }
  0x31   :  { %vm54_vm4 = vmand %vm53_vm2, %vm41_vm1 }
  0x32   :  { %v55_v23 = vsel %vm54_vm4, 1.0, %v367_v1 }
  0x33   :  { %v57_v24 = vsel %vm56_vm3, %v55_v23, 0.0 }
  0x34   :  { %v58_v25 = vrot.slane %v57_v24, 4 }
  0x36   :  { %v59_v26 = vadd.f32 %v58_v25, %v57_v24 }
  0x38   :  { %v60_v27 = vrot.slane %v59_v26, 2 }
  0x3a   :  { %v61_v28 = vadd.f32 %v60_v27, %v59_v26 }
  0x3c   :  { %v62_v29 = vrot.slane %v61_v28, 1 }
  0x3e   :  { %v63_v30 = vadd.f32 %v62_v29, %v61_v28 }
  0x40   :  { %v64_v31 = vadd.f32 1e-06, %v63_v30 }
  0x42   :  { %326 = vrcp.f32 %v64_v31 }
  0x4f   :  { %v327_v32 = vpop.eup %326 }
  0x50   :  { %v66_v34 = vmul.f32 0.5, %v327_v32 }
  0x52   :  { %v67_v35 = vmul.f32 %v66_v34, %v55_v23 }
  0x54   :  { %v69_v36 = vadd.f32 1.0, %v67_v35 }
  0x56   :  { %v70_v37 = vsel %vm68_vm5, %v69_v36, %v67_v35 }
  0x57   :  { %v71_v38 = vsel %vm56_vm3, %v70_v37, 0.0 }
  0x58   :  { %72 = vadd.xlane.f32.xlu0 %v71_v38 }
  0xe1   :  { %v73_v39 = vpop.xlane.xlu0 %72 }
  0xe2   :  { %328 = vrsqrt.f32 %v73_v39 }
  0xef   :  { %v329_v40 = vpop.eup %328 }
  0xf0   :  { %v75_v41 = vmul.f32 %v329_v40, %v70_v37  ;;  %v176_v42 = vpop.f32.mrf.mxu0 }
  0xf1   :  { %v182_v43 = vpack.c.bf16 %v176_v42, %v176_v42 }
  0xf2   :  { %v76_v44 = vpack.c.bf16 %v75_v41, %v75_v41  ;;  %v303_v45 = vpop.f32.mrf.mxu0 }
  0xf3   :  { %v204_v46 = vsel %vm202_vm6, %v182_v43, 0 }
  0xf4   :  { %183 = vxpose.xlu0.c.b16.start.end [1/1] (short) (narrow) %v76_v44, 16  ;;  %v179_v47 = vpop.f32.mrf.mxu0  ;;  %306 = vmatpush3.bf16.msra.mxu1 %v204_v46 }
  0xf6   :  { %v304_v48 = vpop.f32.mrf.mxu0 }
 0x156   :  { %v191_v49 = vpop.trf.xlu0 }
 0x157   :  { %308 = vmatmul.mubr.msk.bf16.vlgmr.msra.gmra.mxu1 %vm56_vm3, %v191_v49 }
 0x217   :  { %v240_v50 = vpop.f32.mrf.mxu1 }
 0x218   :  { %v246_v51 = vmul.f32 %v329_v40, %v240_v50 }
 0x219   :  { %v309_v52 = vpop.f32.mrf.mxu1 }
 0x21a   :  { %247 = vst [vmem:[#allocation5] sm:$0xff] %v246_v51 }
 0x21b   :  { %v243_v53 = vpop.f32.mrf.mxu1 }
 0x21c   :  { %353 = shalt.err (!%p350_p9)
}
 0x21d   :  { %257 = dma.vmem_to_hbm [thread:$0]  %s255_s3, 128, %s438_s4, [#allocation3]   ;;  %v310_v54 = vpop.f32.mrf.mxu1 }
 0x21e   :  { %364 = dma.done.wait [#allocation3], 128  }
 0x21f   :  { %365 = vsyncadd [#allocation3], 4294967168 }
 0x220   :  { %261 = vsyncpa [#allocation3], 1 }
 0x221   :  { %262 = vsyncpa [#allocation4], 1 }

</bundles_post_ra>
